<compile_context>
chip_gen: v7x
topology: tpu7x:2x2x1
jax: 0.10.0
libtpu: 0.0.40
codegen_flags: <defaults>
</compile_context>

<pallas_src>
import jax
import jax.numpy as jnp
from jax.experimental import pallas as pl
from jax.experimental.pallas import tpu as pltpu

EPS = 1e-8


def _cln_kernel(x_ref, w_ref, b_ref, o_ref):
    # x_ref: (nb, C, T_tile) -- C on the sublane axis, spatial on the lane axis.
    # w_ref, b_ref: (C, 1)   -- broadcast across batch and lanes inside the kernel.
    x = x_ref[...].astype(jnp.float32)                          # (nb, C, T)
    mean = jnp.mean(x, axis=1, keepdims=True)                   # (nb, 1, T)
    centered = x - mean
    var = jnp.mean(centered * centered, axis=1, keepdims=True)  # biased, like nn.LayerNorm
    inv = jax.lax.rsqrt(var + EPS)                              # (nb, 1, T)
    w = w_ref[...].astype(jnp.float32)                          # (C, 1)
    b = b_ref[...].astype(jnp.float32)
    # Fold weight into the per-position scale; single fused expression for the store.
    o_ref[...] = (centered * (inv * w) + b).astype(o_ref.dtype)


def _cdiv(a, b):
    return -(-a // b)


def _divisors(n):
    ds = set()
    i = 1
    while i * i <= n:
        if n % i == 0:
            ds.add(i)
            ds.add(n // i)
        i += 1
    return sorted(ds)


def _vmem_limit_bytes():
    """Per-generation scoped-VMEM budget (~48 MiB on v7x, 64 MiB on v5e/v6e)."""
    try:
        cap = pltpu.get_tpu_info().vmem_capacity_bytes
    except Exception:
        cap = 64 << 20  # conservative fallback (v7x physical per-TC VMEM)
    return int(min(cap * 3 // 4, 64 << 20))


def _pick_blocking(N, C, T, itemsize, vmem_limit):
    """Choose (nb, tile): batch elements per block and spatial lanes per block.

    Budget: 2x input + 2x output double buffers of the block in its native dtype,
    plus ~2 f32 intermediates of the same element count inside the kernel.
    """
    c_pad = _cdiv(C, 8) * 8                    # sublane padding estimate in VMEM
    factor = 4.0 + 8.0 / itemsize              # 4x dtype buffers + 2x f32 intermediates
    target_bytes = int(min(8 << 20, (vmem_limit * 0.8) / factor))
    target_bytes = max(target_bytes, 512 << 10)

    bytes_per_lane = c_pad * itemsize          # bytes per spatial position per batch elem

    nb = 1
    if T * bytes_per_lane <= target_bytes:
        # Whole spatial extent fits: block multiple batch elements per step.
        tile = T
        nb_max = max(1, target_bytes // max(1, T * bytes_per_lane))
        divs = _divisors(N)
        fitting = [d for d in divs if d <= nb_max]
        nb = fitting[-1] if fitting else 1
    else:
        # Tile the spatial axis; lane-aligned (multiple of 128).
        tile = max(128, (target_bytes // bytes_per_lane) // 128 * 128)
        if tile >= T:
            tile = T

    # Guarantee enough grid blocks for megacore / v7x dual-TC sharding.
    min_blocks = 8

    def blocks(nb_, tile_):
        return _cdiv(N, nb_) * _cdiv(T, tile_)

    divs = _divisors(N)
    while nb > 1 and blocks(nb, tile) < min_blocks:
        smaller = [d for d in divs if d < nb]
        if not smaller:
            break
        nb = smaller[-1]
    while blocks(nb, tile) < min_blocks and tile > 1024:
        new_tile = max(1024, _cdiv(tile // 2, 128) * 128)
        if new_tile >= tile:
            break
        tile = new_tile

    return nb, tile


def _cln_over_channel(x, weight, bias):
    """LayerNorm over the channel axis of channel-first x: [N, C, T]."""
    N, C, T = x.shape
    vmem_limit = _vmem_limit_bytes()
    nb, tile = _pick_blocking(N, C, T, x.dtype.itemsize, vmem_limit)
    grid = (_cdiv(N, nb), _cdiv(T, tile))

    w2d = weight.reshape(C, 1)
    b2d = bias.reshape(C, 1)

    return pl.pallas_call(
        _cln_kernel,
        out_shape=jax.ShapeDtypeStruct((N, C, T), x.dtype),
        grid_spec=pltpu.PrefetchScalarGridSpec(
            num_scalar_prefetch=0,
            grid=grid,
            in_specs=[
                pl.BlockSpec((nb, C, tile), lambda n, t: (n, 0, t)),
                pl.BlockSpec((C, 1), lambda n, t: (0, 0)),
                pl.BlockSpec((C, 1), lambda n, t: (0, 0)),
            ],
            out_specs=pl.BlockSpec((nb, C, tile), lambda n, t: (n, 0, t)),
        ),
        compiler_params=pltpu.CompilerParams(
            dimension_semantics=("parallel", "parallel"),
            vmem_limit_bytes=vmem_limit,
        ),
    )(x, w2d, b2d)


@jax.jit
def cumulative_layer_norm(x, weight, bias):
    """Forward pass of CumulativeLayerNorm.

    x: [N, C, K, S] or [N, C, L] (channel-first, as in the PyTorch module).
    weight, bias: [C]
    """
    # TODO(synk): despite the name, the reference module is plain nn.LayerNorm over C
    # (not the Conv-TasNet running-cumulative cLN); this kernel matches that forward.
    if x.ndim == 4:
        N, C, K, S = x.shape
        y = _cln_over_channel(x.reshape(N, C, K * S), weight, bias)
        return y.reshape(N, C, K, S)
    elif x.ndim == 3:
        return _cln_over_channel(x, weight, bias)
    else:
        # Matches the PyTorch module: other ranks are returned unchanged.
        return x


def _reference(x, weight, bias):
    # Pure-JAX reference of the same forward (explicit transpose formulation).
    if x.ndim == 4:
        xt = jnp.transpose(x, (0, 2, 3, 1))
    else:
        xt = jnp.transpose(x, (0, 2, 1))
    mean = jnp.mean(xt, axis=-1, keepdims=True)
    var = jnp.mean((xt - mean) ** 2, axis=-1, keepdims=True)
    y = (xt - mean) / jnp.sqrt(var + EPS) * weight + bias
    if x.ndim == 4:
        return jnp.transpose(y, (0, 3, 1, 2))
    return jnp.transpose(y, (0, 2, 1))


if __name__ == "__main__":
    key = jax.random.PRNGKey(0)
    k1, k2 = jax.random.split(key)

    # 4-D case: [N, C, K, S]
    N, C, K, S = 2, 4, 16, 16
    x4 = jax.random.normal(k1, (N, C, K, S), dtype=jnp.float32)

    # Deterministic non-trivial affine params (LayerNorm default init is w=1, b=0).
    weight = 1.0 + 0.1 * jnp.arange(C, dtype=jnp.float32)
    bias = 0.01 * jnp.arange(C, dtype=jnp.float32)

    y4 = cumulative_layer_norm(x4, weight, bias)
    jax.block_until_ready(y4)
    ref4 = _reference(x4, weight, bias)
    assert y4.shape == x4.shape
    assert jnp.allclose(y4, ref4, atol=1e-5, rtol=1e-5)

    # 3-D case: [N, C, L]
    x3 = jax.random.normal(k2, (N, C, 8), dtype=jnp.float32)
    y3 = cumulative_layer_norm(x3, weight, bias)
    jax.block_until_ready(y3)
    ref3 = _reference(x3, weight, bias)
    assert y3.shape == x3.shape
    assert jnp.allclose(y3, ref3, atol=1e-5, rtol=1e-5)

    print("KERNEL_OK")
</pallas_src>

<mosaic_0001>
module attributes {stable_mosaic.version = 11 : i64} {
  func.func @_cln_kernel(%arg0: i32, %arg1: i32, %arg2: memref<1x4x256xf32, #tpu.memory_space<vmem>>, %arg3: memref<4x1xf32, #tpu.memory_space<vmem>>, %arg4: memref<4x1xf32, #tpu.memory_space<vmem>>, %arg5: memref<1x4x256xf32, #tpu.memory_space<vmem>>) attributes {dimension_semantics = [#tpu.dimension_semantics<parallel>, #tpu.dimension_semantics<parallel>], iteration_bounds = array<i64: 2, 1>, scalar_prefetch = 0 : i64, scratch_operands = 0 : i64, tpu.core_type = #tpu.core_type<tc>, window_params = [{transform_indices = @transform_0, window_bounds = array<i64: 1, 4, 256>}, {pipeline_mode = #tpu.pipeline_mode<synchronous>, transform_indices = @transform_1, window_bounds = array<i64: 4, 1>}, {pipeline_mode = #tpu.pipeline_mode<synchronous>, transform_indices = @transform_2, window_bounds = array<i64: 4, 1>}, {transform_indices = @transform_3, window_bounds = array<i64: 1, 4, 256>}]} {
    %c0 = arith.constant 0 : index
    %c0_0 = arith.constant 0 : index
    %c0_1 = arith.constant 0 : index
    %0 = vector.load %arg2[%c0, %c0_0, %c0_1] : memref<1x4x256xf32, #tpu.memory_space<vmem>>, vector<1x4x256xf32>
    %cst = arith.constant dense<0.000000e+00> : vector<1x256xf32>
    %1 = vector.multi_reduction <add>, %0, %cst [1] : vector<1x4x256xf32> to vector<1x256xf32>
    %2 = vector.shape_cast %1 : vector<1x256xf32> to vector<1x1x256xf32>
    %cst_2 = arith.constant 4.000000e+00 : f32
    %3 = vector.broadcast %cst_2 : f32 to vector<1x1x256xf32>
    %4 = arith.divf %2, %3 : vector<1x1x256xf32>
    %5 = vector.broadcast %4 : vector<1x1x256xf32> to vector<1x4x256xf32>
    %6 = arith.subf %0, %5 : vector<1x4x256xf32>
    %7 = arith.mulf %6, %6 : vector<1x4x256xf32>
    %cst_3 = arith.constant dense<0.000000e+00> : vector<1x256xf32>
    %8 = vector.multi_reduction <add>, %7, %cst_3 [1] : vector<1x4x256xf32> to vector<1x256xf32>
    %9 = vector.shape_cast %8 : vector<1x256xf32> to vector<1x1x256xf32>
    %cst_4 = arith.constant 4.000000e+00 : f32
    %10 = vector.broadcast %cst_4 : f32 to vector<1x1x256xf32>
    %11 = arith.divf %9, %10 : vector<1x1x256xf32>
    %cst_5 = arith.constant 9.99999993E-9 : f32
    %12 = vector.broadcast %cst_5 : f32 to vector<1x1x256xf32>
    %13 = arith.addf %11, %12 : vector<1x1x256xf32>
    %14 = math.rsqrt %13 : vector<1x1x256xf32>
    %c0_6 = arith.constant 0 : index
    %c0_7 = arith.constant 0 : index
    %15 = vector.load %arg3[%c0_6, %c0_7] : memref<4x1xf32, #tpu.memory_space<vmem>>, vector<4x1xf32>
    %c0_8 = arith.constant 0 : index
    %c0_9 = arith.constant 0 : index
    %16 = vector.load %arg4[%c0_8, %c0_9] : memref<4x1xf32, #tpu.memory_space<vmem>>, vector<4x1xf32>
    %17 = vector.shape_cast %15 : vector<4x1xf32> to vector<1x4x1xf32>
    %18 = vector.broadcast %14 : vector<1x1x256xf32> to vector<1x4x256xf32>
    %19 = vector.broadcast %17 : vector<1x4x1xf32> to vector<1x4x256xf32>
    %20 = arith.mulf %18, %19 : vector<1x4x256xf32>
    %21 = arith.mulf %6, %20 : vector<1x4x256xf32>
    %22 = vector.shape_cast %16 : vector<4x1xf32> to vector<1x4x1xf32>
    %23 = vector.broadcast %22 : vector<1x4x1xf32> to vector<1x4x256xf32>
    %24 = arith.addf %21, %23 : vector<1x4x256xf32>
    %c0_10 = arith.constant 0 : index
    %c0_11 = arith.constant 0 : index
    %c0_12 = arith.constant 0 : index
    %25 = vector.load %arg5[%c0_10, %c0_11, %c0_12] : memref<1x4x256xf32, #tpu.memory_space<vmem>>, vector<1x4x256xf32>
    tpu.vector_store %arg5[%c0_10, %c0_11, %c0_12], %24 {strides = array<i32>} : memref<1x4x256xf32, #tpu.memory_space<vmem>>, vector<1x4x256xf32>,
    return
  }
  func.func @transform_0(%arg0: i32, %arg1: i32) -> (i32, i32, i32) {
    %c0_i32 = arith.constant 0 : i32
    %c0_i32_0 = arith.constant 0 : i32
    return %arg0, %c0_i32, %arg1 : i32, i32, i32
  }
  func.func @transform_1(%arg0: i32, %arg1: i32) -> (i32, i32) {
    %c0_i32 = arith.constant 0 : i32
    %c0_i32_0 = arith.constant 0 : i32
    %c0_i32_1 = arith.constant 0 : i32
    return %c0_i32, %c0_i32_0 : i32, i32
  }
  func.func @transform_2(%arg0: i32, %arg1: i32) -> (i32, i32) {
    %c0_i32 = arith.constant 0 : i32
    %c0_i32_0 = arith.constant 0 : i32
    %c0_i32_1 = arith.constant 0 : i32
    return %c0_i32, %c0_i32_0 : i32, i32
  }
  func.func @transform_3(%arg0: i32, %arg1: i32) -> (i32, i32, i32) {
    %c0_i32 = arith.constant 0 : i32
    %c0_i32_0 = arith.constant 0 : i32
    return %arg0, %c0_i32, %arg1 : i32, i32, i32
  }
}

</mosaic_0001>

<bundles_post_ra>
// kernel: cumulative_layer_norm.1
= control target key start
LH: loop header
LB: loop body
LE: loop exit
PB: predicated region body
PF: predicated region fallthrough
CT: control target
= control target key end

     0   :  { %s467_s12 = smov 0   ;;  %s469_s13 = smov 0   ;;  %s517_s0 = inlined_call_operand.vmem [shape: f32[2,4,256], index: 0, kind: input, shape index: {}]   ;;  %s518_s1 = inlined_call_operand.vmem [shape: f32[4,1], index: 1, kind: input, shape index: {}]   ;;  %s519_s2 = inlined_call_operand.vmem [shape: f32[4,1], index: 2, kind: input, shape index: {}]   ;;  %s520_s3 = inlined_call_operand.vmem [shape: f32[2,4,256], index: 3, kind: output, shape index: {}]  }
   0x1   :  { %s471_s14 = smov 0  }
   0x2 LB: > { %s25_s15 = sadd.s32 1, %s439_s13  ;;  %p380_p0 = scmp.ge.s32.totalorder %s443_s14, 1  ;;  %s443_s14 = sphi %s471_s14, %s13_s14   ;;  %s439_s13 = sphi %s469_s13, %s522_s13   ;;  %s435_s12 = sphi %s467_s12, %s521_s12  }
   0x3   : > { %p27_p1 = scmp.ge.s32.totalorder %s25_s15, 2  ;;  %p158_p2 = scmp.lt.s32.totalorder %s443_s14, 3 }
   0x5   : > { %s524_s15 = smov (%p27_p1, %s25_s15), 0  ;;  %p159_p3 = pnand %p380_p0, %p158_p2 }
   0x6   : > { %v261_v0 = vld [vmem:[%s518_s1] sm:$0xf] (!%p159_p3)  ;;  %v445_v1 = vmov (!%p159_p3), 0   ;;  %p191_p4 = scmp.lt.s32.totalorder (!%p159_p3), %s435_s12, 1  ;;  %vm214_vm0 = vcmask (!%p159_p3), 1043456   ;;  %v282_v45 = vlaneseq (!%p159_p3) }
   0x7   : > { %162 = sbr.rel (%p159_p3) target bundleno = 145 (0x91), region = 32  ;;  %415 = vset.pattern.permute.xlu0 (!%p159_p3), %v445_v1  ;;  %v262_v2 = vld [vmem:[%s519_s2] sm:$0xf] (!%p159_p3)  ;;  %v446_v43 = vmov (!%p159_p3), 839922192  }
   0x8   : > { %265 = vperm.xlu0 (!%p159_p3), %415, %v261_v0   ;;  %v280_v44 = vunpack.c.l.s4 (!%p159_p3), %v446_v43  ;;  %v283_v48 = vshrl.u32 (!%p159_p3), %v282_v45, 7 }
   0xa   : > { %v281_v47 = vunpack.c.0.s8 (!%p159_p3), %v280_v44 }
   0xc   : > { %277 = vperm.xlu0 (!%p159_p3), %415, %v262_v2   ;;  %v284_v53 = vsub.s32 (!%p159_p3), %v281_v47, %v283_v48 }
   0xe   : > { %s526_s12 = smov (!%p191_p4, %s435_s12), 1 }
   0xf   : > { %s387_s20 = sshll.u32 %s526_s12, 3 }
  0x10   : > { %s198_s23 = scalar_lea.vmem %s517_s0, %s387_s20  ;;  %s208_s26 = scalar_lea.vmem %s520_s3, %s387_s20 }
  0x11   : > { %v210_v3 = vld [vmem:[%s198_s23] sm:$0xff] }
  0x12   : > { %v212_v4 = vcombine.high %v210_v3, %v210_v3  ;;  %v215_v5 = vsel %vm214_vm0, %v210_v3, 0.0 }
  0x13   : > { %v216_v7 = vrot.slane %v215_v5, 4 }
  0x14   : > { %v222_v6 = vsel %vm214_vm0, %v212_v4, 0.0 }
  0x15   : > { %v223_v8 = vrot.slane %v222_v6, 4  ;;  %v217_v9 = vadd.f32 %v216_v7, %v215_v5 }
  0x17   : > { %v224_v10 = vadd.f32 %v223_v8, %v222_v6  ;;  %v218_v11 = vrot.slane %v217_v9, 2 }
  0x19   : > { %v225_v12 = vrot.slane %v224_v10, 2  ;;  %v219_v13 = vadd.f32 %v218_v11, %v217_v9 }
  0x1b   : > { %v226_v14 = vadd.f32 %v225_v12, %v224_v10  ;;  %v220_v15 = vrot.slane %v219_v13, 1 }
  0x1d   : > { %v227_v16 = vrot.slane %v226_v14, 1  ;;  %v221_v17 = vadd.f32 %v220_v15, %v219_v13 }
  0x1f   : > { %v228_v18 = vadd.f32 %v227_v16, %v226_v14  ;;  %v230_v19 = vmul.f32 0.25, %v221_v17 }
  0x21   : > { %v231_v20 = vmul.f32 0.25, %v228_v18 }
  0x23   : > { %v234_v21 = vcombine.low %v230_v19, %v231_v20 }
  0x25   : > { %v236_v22 = vsub.f32 %v210_v3, %v234_v21 }
  0x27   : > { %v237_v23 = vmul.f32 %v236_v22, %v236_v22 }
  0x29   : > { %v239_v24 = vcombine.high %v237_v23, %v237_v23  ;;  %v241_v25 = vsel %vm214_vm0, %v237_v23, 0.0 }
  0x2a   : > { %v242_v27 = vrot.slane %v241_v25, 4 }
  0x2b   : > { %v248_v26 = vsel %vm214_vm0, %v239_v24, 0.0 }
  0x2c   : > { %v249_v28 = vrot.slane %v248_v26, 4  ;;  %v243_v29 = vadd.f32 %v242_v27, %v241_v25 }
  0x2e   : > { %v250_v30 = vadd.f32 %v249_v28, %v248_v26  ;;  %v244_v31 = vrot.slane %v243_v29, 2 }
  0x30   : > { %v251_v32 = vrot.slane %v250_v30, 2  ;;  %v245_v33 = vadd.f32 %v244_v31, %v243_v29 }
  0x32   : > { %v252_v34 = vadd.f32 %v251_v32, %v250_v30  ;;  %v246_v35 = vrot.slane %v245_v33, 1 }
  0x34   : > { %v253_v36 = vrot.slane %v252_v34, 1  ;;  %v247_v37 = vadd.f32 %v246_v35, %v245_v33 }
  0x36   : > { %v254_v38 = vadd.f32 %v253_v36, %v252_v34  ;;  %v255_v39 = vmul.f32 0.25, %v247_v37 }
  0x38   : > { %v256_v40 = vmul.f32 0.25, %v254_v38  ;;  %v257_v41 = vadd.f32 1e-08, %v255_v39 }
  0x3a   : > { %v258_v42 = vadd.f32 1e-08, %v256_v40  ;;  %417 = vrsqrt.f32 %v257_v41 }
  0x3c   : > { %419 = vrsqrt.f32 %v258_v42 }
  0x44   : > { %v418_v46 = vpop.eup %417 }
  0x46   : > { %v420_v49 = vpop.eup %419 }
  0x87   : > { %v266_v50 = vpop.permute.xlu0 %265 }
  0x88   : > { %v268_v51 = vmul.f32 %v418_v46, %v266_v50  ;;  %v269_v52 = vmul.f32 %v420_v49, %v266_v50 }
  0x8a   : > { %v272_v54 = vcombine.low %v268_v51, %v269_v52 }
  0x8b   : > { %v278_v55 = vpop.permute.xlu0 %277 }
  0x8c   : > { %v274_v56 = vmul.f32 %v272_v54, %v236_v22  ;;  %v285_v57 = vrot.slane %v278_v55, %v284_v53 }
  0x8e   : > { %v287_v58 = vadd.f32 %v285_v57, %v274_v56 }
  0x90   : > { %288 = vst [vmem:[%s208_s26] sm:$0xff] %v287_v58 }
  0x91 PF: > { %s13_s14 = sadd.s32 1, %s443_s14   ;;  %s521_s12 = smov %s439_s13 }
  0x92   : > { %p10_p5 = scmp.ge.s32.totalorder %s13_s14, 4   ;;  %s522_s13 = smov %s524_s15 }
  0x94   :  { %12 = sbr.rel (!%p10_p5) target bundleno = 2 (0x2), region = 62 }

</bundles_post_ra>
